<compile_context>
chip_gen: v5e
topology: v5e:2x2
jax: 0.10.0
libtpu: 0.0.40
codegen_flags: <defaults>
</compile_context>

<pallas_src>
import jax
import jax.numpy as jnp
from jax.experimental import pallas as pl
from jax.experimental.pallas import tpu as pltpu


def _round_up(x, m):
    return ((x + m - 1) // m) * m


def _select_budgets():
    """(single-buffer input tile budget bytes, vmem_limit_bytes) per chip gen."""
    cap = None
    try:
        cap = int(pltpu.get_tpu_info().vmem_capacity_bytes)
    except Exception:
        cap = None
    if cap is not None and cap >= 96 * 1024 * 1024:
        # v5e / v6e: 128 MiB physical VMEM -> fat tiles, fewer grid steps.
        return 16 * 1024 * 1024, 64 * 1024 * 1024
    # v7x (64 MiB physical VMEM) or unknown: stay conservative.
    return 8 * 1024 * 1024, 32 * 1024 * 1024


def _make_dice_kernel(s_total, tile_s, needs_mask):
    """Per-tile kernel (s_total / tile_s / mask flag are Python-static)."""

    def kernel(x_ref, t_ref, num_ref, den_ref):
        k_id = pl.program_id(1)

        @pl.when(k_id == 0)
        def _init():
            num_ref[...] = jnp.zeros_like(num_ref)
            den_ref[...] = jnp.zeros_like(den_ref)

        x = x_ref[...].astype(jnp.float32)          # (N, C, T), f32 math
        tgt = t_ref[...].astype(jnp.int32)          # (N, 1, T)
        n, c, t = x.shape

        # Numerically stable softmax over the class (sublane) axis.
        m = jnp.max(x, axis=1, keepdims=True)                 # (N, 1, T)
        e = jnp.exp(x - m)                                    # EUP
        inv = 1.0 / jnp.sum(e, axis=1, keepdims=True)         # one divide per column
        prob = e * inv                                        # (N, C, T)

        # One-hot of the target along classes: (1, C, T) iota broadcast over N.
        cls = jax.lax.broadcasted_iota(jnp.int32, (1, c, t), 1)
        onehot = (tgt == cls).astype(jnp.float32)             # (N, C, T)

        if needs_mask:
            # Only emitted when the grid over-covers S.  Zero BOTH prob and
            # onehot for out-of-range columns (NaN/Inf-safe vs. garbage data
            # in the un-padded tail / clamped redundant blocks).
            blk = pl.program_id(0) * pl.num_programs(1) + k_id
            pos = blk * tile_s + jax.lax.broadcasted_iota(jnp.int32, (1, 1, t), 2)
            valid = pos < s_total
            prob = jnp.where(valid, prob, 0.0)
            onehot = jnp.where(valid, onehot, 0.0)

        # BinaryDiceLoss partial sums per (batch, class), power p = 2
        # (one-hot^2 == one-hot).  Cross-lane reduction -> XLU.
        num_tile = jnp.sum(prob * onehot, axis=2)              # (N, C)
        den_tile = jnp.sum(prob * prob + onehot, axis=2)       # (N, C)

        num_ref[...] += num_tile[None, :, :]
        den_ref[...] += den_tile[None, :, :]

    return kernel


def dice_loss(x_nchw, target_nhw, *, num_parts=2, tile_s=None):
    """x_nchw: [N, C, H, W] float (f32 or bf16) logits. target_nhw: [N, H, W] int."""
    n, c = int(x_nchw.shape[0]), int(x_nchw.shape[1])
    s = 1
    for d in x_nchw.shape[2:]:
        s *= int(d)

    # Keep the caller's logits dtype (bf16 halves the dominant HBM stream);
    # math is f32 inside the kernel.  Target goes int8 when it fits (4x fewer
    # bytes on the secondary stream), upcast in-kernel.
    x_r = jnp.reshape(x_nchw, (n, c, s))
    t_dtype = jnp.int8 if c <= 127 else jnp.int32
    t_r = jnp.reshape(target_nhw, (n, 1, s)).astype(t_dtype)

    itemsize = jnp.dtype(x_r.dtype).itemsize
    sublane = max(8, 32 // itemsize)               # f32: 8, bf16: 16, fp8/int8: 32
    c_pad = _round_up(c, sublane)                  # real VMEM footprint of C

    tile_budget, vmem_limit = _select_budgets()

    if tile_s is None:
        # Bytes per lane of one (logits + target) tile set, with sublane padding
        # (the target's size-1 class dim pads to a full 32-byte sublane group).
        per_lane_bytes = n * (c_pad * itemsize + 32)
        tile_s = tile_budget // max(1, per_lane_bytes)
        tile_s = max(128, min(tile_s, 64 * 1024))
        tile_s = (tile_s // 128) * 128                              # lane-aligned
        # Don't exceed one partition's share of S (keeps both v7x TCs busy).
        tile_s = min(tile_s, _round_up(pl.cdiv(s, max(1, num_parts)), 128))
    tile_s = max(128, (tile_s // 128) * 128)

    total_k = pl.cdiv(s, tile_s)                   # real tiles needed to cover S
    num_parts = max(1, min(num_parts, total_k))
    k_per_part = pl.cdiv(total_k, num_parts)       # equal tile count per partition
    needs_mask = (num_parts * k_per_part * tile_s) != s
    last_blk = total_k - 1

    # Clamp the lane-block index so a (rare) fully-out-of-bounds redundant block
    # just re-reads the last valid block; its contribution is masked to zero.
    def in_map(p, k):
        return (0, 0, jnp.minimum(p * k_per_part + k, last_blk))

    kernel = _make_dice_kernel(s, tile_s, needs_mask)

    num_p, den_p = pl.pallas_call(
        kernel,
        out_shape=(
            jax.ShapeDtypeStruct((num_parts, n, c), jnp.float32),
            jax.ShapeDtypeStruct((num_parts, n, c), jnp.float32),
        ),
        grid_spec=pltpu.PrefetchScalarGridSpec(
            num_scalar_prefetch=0,
            grid=(num_parts, k_per_part),
            in_specs=[
                pl.BlockSpec((n, c, tile_s), in_map),
                pl.BlockSpec((n, 1, tile_s), in_map),
            ],
            out_specs=[
                pl.BlockSpec((1, n, c), lambda p, k: (p, 0, 0)),
                pl.BlockSpec((1, n, c), lambda p, k: (p, 0, 0)),
            ],
        ),
        compiler_params=pltpu.CompilerParams(
            dimension_semantics=("parallel", "arbitrary"),
            vmem_limit_bytes=vmem_limit,
        ),
    )(x_r, t_r)

    # Tiny finalize in plain JAX: combine partition partials, per-class dice,
    # mean over classes (empty ignore set, no class weights, power=2).
    num_c = jnp.sum(num_p, axis=(0, 1))                      # (C,)
    den_c = jnp.sum(den_p, axis=(0, 1))                      # (C,)
    loss_c = jnp.where(den_c == 0.0, 0.0,
                       -jnp.log(2.0 * num_c / den_c + 1e-5))
    return jnp.sum(loss_c) / jnp.float32(c)


def _dice_loss_ref(x_nchw, target_nhw):
    """Pure-JAX reference mirroring the PyTorch module."""
    n, c = x_nchw.shape[0], x_nchw.shape[1]
    p = jax.nn.softmax(x_nchw.astype(jnp.float32), axis=1)
    onehot = jax.nn.one_hot(target_nhw, c, axis=1, dtype=jnp.float32)
    total = jnp.float32(0.0)
    for i in range(c):
        pi = p[:, i].reshape(n, -1)
        ti = onehot[:, i].reshape(n, -1)
        num = jnp.sum(pi * ti)
        den = jnp.sum(pi ** 2 + ti ** 2)
        loss = jnp.where(den == 0.0, 0.0, -jnp.log(2.0 * num / den + 1e-5))
        total = total + loss
    return total / c


if __name__ == "__main__":
    key = jax.random.PRNGKey(0)
    kx, kt = jax.random.split(key)

    N, C, H, W = 2, 4, 16, 16
    x = jax.random.normal(kx, (N, C, H, W), dtype=jnp.float32)
    target = jax.random.randint(kt, (N, H, W), 0, C, dtype=jnp.int32)

    loss = jax.block_until_ready(dice_loss(x, target))
    ref = jax.block_until_ready(_dice_loss_ref(x, target))

    assert jnp.allclose(loss, ref, rtol=1e-5, atol=1e-5), (loss, ref)
    print("KERNEL_OK")
</pallas_src>

<mosaic_0001>
module attributes {stable_mosaic.version = 11 : i64} {
  func.func @kernel(%arg0: i32, %arg1: i32, %arg2: memref<2x4x128xf32, #tpu.memory_space<vmem>>, %arg3: memref<2x1x128xi8, #tpu.memory_space<vmem>>, %arg4: memref<1x2x4xf32, #tpu.memory_space<vmem>>, %arg5: memref<1x2x4xf32, #tpu.memory_space<vmem>>) attributes {dimension_semantics = [#tpu.dimension_semantics<parallel>, #tpu.dimension_semantics<arbitrary>], iteration_bounds = array<i64: 2, 1>, scalar_prefetch = 0 : i64, scratch_operands = 0 : i64, tpu.core_type = #tpu.core_type<tc>, window_params = [{transform_indices = @transform_0, window_bounds = array<i64: 2, 4, 128>}, {transform_indices = @transform_1, window_bounds = array<i64: 2, 1, 128>}, {transform_indices = @transform_2, window_bounds = array<i64: 1, 2, 4>}, {transform_indices = @transform_3, window_bounds = array<i64: 1, 2, 4>}]} {
    %c0_i32 = arith.constant 0 : i32
    %0 = arith.cmpi eq, %arg1, %c0_i32 : i32
    %1 = arith.extui %0 : i1 to i32
    %c0_i32_0 = arith.constant 0 : i32
    %2 = arith.cmpi ne, %1, %c0_i32_0 : i32
    scf.if %2 {
      %cst_22 = arith.constant 0.000000e+00 : f32
      %36 = vector.broadcast %cst_22 : f32 to vector<1x2x4xf32>
      %c0_23 = arith.constant 0 : index
      %c0_24 = arith.constant 0 : index
      %c0_25 = arith.constant 0 : index
      %37 = vector.load %arg4[%c0_23, %c0_24, %c0_25] : memref<1x2x4xf32, #tpu.memory_space<vmem>>, vector<1x2x4xf32>
      tpu.vector_store %arg4[%c0_23, %c0_24, %c0_25], %36 {strides = array<i32>} : memref<1x2x4xf32, #tpu.memory_space<vmem>>, vector<1x2x4xf32>,
      %cst_26 = arith.constant 0.000000e+00 : f32
      %38 = vector.broadcast %cst_26 : f32 to vector<1x2x4xf32>
      %c0_27 = arith.constant 0 : index
      %c0_28 = arith.constant 0 : index
      %c0_29 = arith.constant 0 : index
      %39 = vector.load %arg5[%c0_27, %c0_28, %c0_29] : memref<1x2x4xf32, #tpu.memory_space<vmem>>, vector<1x2x4xf32>
      tpu.vector_store %arg5[%c0_27, %c0_28, %c0_29], %38 {strides = array<i32>} : memref<1x2x4xf32, #tpu.memory_space<vmem>>, vector<1x2x4xf32>,
    } else {
    }
    %c0 = arith.constant 0 : index
    %c0_1 = arith.constant 0 : index
    %c0_2 = arith.constant 0 : index
    %3 = vector.load %arg2[%c0, %c0_1, %c0_2] : memref<2x4x128xf32, #tpu.memory_space<vmem>>, vector<2x4x128xf32>
    %c0_3 = arith.constant 0 : index
    %c0_4 = arith.constant 0 : index
    %c0_5 = arith.constant 0 : index
    %4 = vector.load %arg3[%c0_3, %c0_4, %c0_5] : memref<2x1x128xi8, #tpu.memory_space<vmem>>, vector<2x1x128xi8>
    %5 = arith.extsi %4 : vector<2x1x128xi8> to vector<2x1x128xi32>
    %cst = arith.constant dense<0xFF800000> : vector<2x128xf32>
    %6 = vector.multi_reduction <maximumf>, %3, %cst [1] : vector<2x4x128xf32> to vector<2x128xf32>
    %7 = vector.shape_cast %6 : vector<2x128xf32> to vector<2x1x128xf32>
    %8 = vector.broadcast %7 : vector<2x1x128xf32> to vector<2x4x128xf32>
    %9 = arith.subf %3, %8 : vector<2x4x128xf32>
    %10 = math.exp %9 : vector<2x4x128xf32>
    %cst_6 = arith.constant dense<0.000000e+00> : vector<2x128xf32>
    %11 = vector.multi_reduction <add>, %10, %cst_6 [1] : vector<2x4x128xf32> to vector<2x128xf32>
    %12 = vector.shape_cast %11 : vector<2x128xf32> to vector<2x1x128xf32>
    %cst_7 = arith.constant 1.000000e+00 : f32
    %13 = vector.broadcast %cst_7 : f32 to vector<2x1x128xf32>
    %14 = arith.divf %13, %12 : vector<2x1x128xf32>
    %15 = vector.broadcast %14 : vector<2x1x128xf32> to vector<2x4x128xf32>
    %16 = arith.mulf %10, %15 : vector<2x4x128xf32>
    %17 = tpu.iota {dimensions = array<i32: 1>} : vector<1x4x128xi32>
    %18 = vector.broadcast %5 : vector<2x1x128xi32> to vector<2x4x128xi32>
    %19 = vector.broadcast %17 : vector<1x4x128xi32> to vector<2x4x128xi32>
    %20 = arith.cmpi eq, %18, %19 : vector<2x4x128xi32>
    %21 = arith.extui %20 : vector<2x4x128xi1> to vector<2x4x128xi32>
    %22 = arith.sitofp %21 : vector<2x4x128xi32> to vector<2x4x128xf32>
    %23 = arith.mulf %16, %22 : vector<2x4x128xf32>
    %cst_8 = arith.constant dense<0.000000e+00> : vector<2x4xf32>
    %24 = vector.multi_reduction <add>, %23, %cst_8 [2] : vector<2x4x128xf32> to vector<2x4xf32>
    %25 = arith.mulf %16, %16 : vector<2x4x128xf32>
    %26 = arith.addf %25, %22 : vector<2x4x128xf32>
    %cst_9 = arith.constant dense<0.000000e+00> : vector<2x4xf32>
    %27 = vector.multi_reduction <add>, %26, %cst_9 [2] : vector<2x4x128xf32> to vector<2x4xf32>
    %c0_10 = arith.constant 0 : index
    %c0_11 = arith.constant 0 : index
    %c0_12 = arith.constant 0 : index
    %28 = vector.load %arg4[%c0_10, %c0_11, %c0_12] : memref<1x2x4xf32, #tpu.memory_space<vmem>>, vector<1x2x4xf32>
    %29 = vector.shape_cast %24 : vector<2x4xf32> to vector<1x2x4xf32>
    %30 = arith.addf %28, %29 : vector<1x2x4xf32>
    %c0_13 = arith.constant 0 : index
    %c0_14 = arith.constant 0 : index
    %c0_15 = arith.constant 0 : index
    %31 = vector.load %arg4[%c0_13, %c0_14, %c0_15] : memref<1x2x4xf32, #tpu.memory_space<vmem>>, vector<1x2x4xf32>
    tpu.vector_store %arg4[%c0_13, %c0_14, %c0_15], %30 {strides = array<i32>} : memref<1x2x4xf32, #tpu.memory_space<vmem>>, vector<1x2x4xf32>,
    %c0_16 = arith.constant 0 : index
    %c0_17 = arith.constant 0 : index
    %c0_18 = arith.constant 0 : index
    %32 = vector.load %arg5[%c0_16, %c0_17, %c0_18] : memref<1x2x4xf32, #tpu.memory_space<vmem>>, vector<1x2x4xf32>
    %33 = vector.shape_cast %27 : vector<2x4xf32> to vector<1x2x4xf32>
    %34 = arith.addf %32, %33 : vector<1x2x4xf32>
    %c0_19 = arith.constant 0 : index
    %c0_20 = arith.constant 0 : index
    %c0_21 = arith.constant 0 : index
    %35 = vector.load %arg5[%c0_19, %c0_20, %c0_21] : memref<1x2x4xf32, #tpu.memory_space<vmem>>, vector<1x2x4xf32>
    tpu.vector_store %arg5[%c0_19, %c0_20, %c0_21], %34 {strides = array<i32>} : memref<1x2x4xf32, #tpu.memory_space<vmem>>, vector<1x2x4xf32>,
    return
  }
  func.func @transform_0(%arg0: i32, %arg1: i32) -> (i32, i32, i32) {
    %c1_i32 = arith.constant 1 : i32
    %0 = arith.muli %arg0, %c1_i32 : i32
    %1 = arith.addi %0, %arg1 : i32
    %c1_i32_0 = arith.constant 1 : i32
    %2 = arith.minsi %1, %c1_i32_0 : i32
    %c0_i32 = arith.constant 0 : i32
    %c0_i32_1 = arith.constant 0 : i32
    %c0_i32_2 = arith.constant 0 : i32
    return %c0_i32, %c0_i32_1, %2 : i32, i32, i32
  }
  func.func @transform_1(%arg0: i32, %arg1: i32) -> (i32, i32, i32) {
    %c1_i32 = arith.constant 1 : i32
    %0 = arith.muli %arg0, %c1_i32 : i32
    %1 = arith.addi %0, %arg1 : i32
    %c1_i32_0 = arith.constant 1 : i32
    %2 = arith.minsi %1, %c1_i32_0 : i32
    %c0_i32 = arith.constant 0 : i32
    %c0_i32_1 = arith.constant 0 : i32
    %c0_i32_2 = arith.constant 0 : i32
    return %c0_i32, %c0_i32_1, %2 : i32, i32, i32
  }
  func.func @transform_2(%arg0: i32, %arg1: i32) -> (i32, i32, i32) {
    %c0_i32 = arith.constant 0 : i32
    %c0_i32_0 = arith.constant 0 : i32
    %c0_i32_1 = arith.constant 0 : i32
    return %arg0, %c0_i32, %c0_i32_0 : i32, i32, i32
  }
  func.func @transform_3(%arg0: i32, %arg1: i32) -> (i32, i32, i32) {
    %c0_i32 = arith.constant 0 : i32
    %c0_i32_0 = arith.constant 0 : i32
    %c0_i32_1 = arith.constant 0 : i32
    return %arg0, %c0_i32, %c0_i32_0 : i32, i32, i32
  }
}

</mosaic_0001>

<bundles_post_ra>
// kernel: tpu_custom_call.1
= control target key start
LH: loop header
LB: loop body
LE: loop exit
PB: predicated region body
PF: predicated region fallthrough
CT: control target
= control target key end

     0   :  { %9 = vsyncpa [#allocation3], 0  ;;  %s1109_s0 = inlined_call_operand.hbm [shape: f32[2,4,256], index: 0, kind: input, shape index: {}]   ;;  %s1110_s1 = inlined_call_operand.vmem [shape: s8[2,1,256], index: 1, kind: input, shape index: {}]   ;;  %s1111_s2 = inlined_call_operand.hbm [shape: f32[2,2,4], index: 2, kind: output, shape index: {0}]   ;;  %s1112_s3 = inlined_call_operand.hbm [shape: f32[2,2,4], index: 3, kind: output, shape index: {1}]  }
   0x1   :  { %11 = vsyncpa [#allocation3 + $0x1], 0 }
   0x2   :  { %12 = vsyncpa [#allocation4], 0 }
   0x3   :  { %14 = vsyncpa [#allocation4 + $0x1], 0 }
   0x4   :  { %15 = vsyncpa [#allocation8], 0 }
   0x5   :  { %17 = vsyncpa [#allocation8 + $0x1], 0  ;;  %s898_s12 = smov 0   ;;  %s900_s13 = smov 0  }
   0x6   :  { %s902_s14 = smov 0   ;;  %s904_s15 = smov 0  }
   0x7   :  { %s906_s16 = smov 0   ;;  %s908_s17 = smov 0  }
   0x8   :  { %s910_s18 = smov 0   ;;  %s912_s19 = smov 0  }
   0x9   :  { %s914_s20 = smov 0  }
   0xa LB: > { %1116 = sst [smem:[#allocation12_spill]] %s860_s17  ;;  %s588_s21 = sadd.s32 4294967295, %s872_s20   ;;  %s872_s20 = sphi %s914_s20, %s23_s20   ;;  %s868_s19 = sphi %s912_s19, %s1129_s19   ;;  %s864_s18 = sphi %s910_s18, %s1128_s18   ;;  %s860_s17 = sphi %s908_s17, %s1127_s17   ;;  %s856_s16 = sphi %s906_s16, %s1134_s16   ;;  %s852_s15 = sphi %s904_s15, %s1133_s15   ;;  %s848_s14 = sphi %s902_s14, %s1132_s14   ;;  %s844_s13 = sphi %s900_s13, %s1131_s13   ;;  %s840_s12 = sphi %s898_s12, %s1130_s12  }
   0xb   : > { %1117 = sst [smem:[#allocation13_spill]] %s868_s19  ;;  %s589_s22 = sadd.s32 4294967294, %s872_s20  }
   0xc   : > { %s35_s23 = sadd.s32 1, %s868_s19  ;;  %p40_p0 = scmp.lt.s32.totalorder %s868_s19, 1 }
   0xd   : > { %p37_p1 = scmp.ge.s32.totalorder %s35_s23, 2  ;;  %s48_s24 = sadd.s32 1, %s860_s17 }
   0xe   : > { %s947_s25 = scalar_select %p40_p0, %s868_s19, 1 }
   0xf   : > { %s1136_s23 = smov (%p37_p1, %s35_s23), 0  ;;  %p55_p2 = scmp.ne.s32.totalorder %s860_s17, %s856_s16 }
  0x10   : > { %1118 = sst [smem:[#allocation14_spill]] %s1136_s23  ;;  %p56_p3 = scmp.eq.s32.totalorder %s872_s20, 0 }
  0x11   : > { %p43_p4 = scmp.lt.s32.totalorder %s1136_s23, 1  ;;  %p61_p5 = scmp.ne.s32.totalorder %s856_s16, %s852_s15 }
  0x12   : > { %p956_p6 = por %p56_p3, %p55_p2  ;;  %p62_p7 = scmp.eq.s32.totalorder %s588_s21, 0 }
  0x13   : > { %s44_s27 = scalar_select %p43_p4, %s1136_s23, 1 }
  0x14   : > { %p961_p8 = por %p62_p7, %p61_p5  ;;  %s103_s29 = ssub.s32 %s868_s19, %s1136_s23 }
  0x15   : > { %s45_s30 = ssub.s32 %s947_s25, %s44_s27  ;;  %p104_p9 = scmp.eq.s32.totalorder %s103_s29, 0 }
  0x16   : > { %p46_p10 = scmp.eq.s32.totalorder %s45_s30, 0  ;;  %s106_s4 = sadd.s32 1, %s848_s14 }
  0x17   : > { %s970_s5 = scalar_select %p104_p9, %s848_s14, %s106_s4  }
  0x18   : > { %s973_s6 = scalar_select %p46_p10, %s860_s17, %s48_s24  }
  0x19   : > { %1121 = sst [smem:[#allocation15_spill]] %s970_s5  ;;  %p116_p11 = scmp.ne.s32.totalorder %s848_s14, %s844_s13 }
  0x1a   : > { %1122 = sst [smem:[#allocation16_spill]] %s973_s6  ;;  %p117_p12 = scmp.eq.s32.totalorder %s588_s21, 1 }
  0x1b   : > { %p122_p13 = scmp.ne.s32.totalorder %s844_s13, %s840_s12  ;;  %p123_p0 = scmp.eq.s32.totalorder %s589_s22, 1 }
  0x1c   : > { %p979_p1 = por %p117_p12, %p116_p11  ;;  %p591_p3 = scmp.ge.s32.totalorder %s872_s20, 2 }
  0x1d   : > { %p983_p2 = por %p123_p0, %p122_p13  ;;  %s169_s9 = sand.u32 (!%p591_p3), 1, %s860_s17  }
  0x1e   : > { %165 = sbr.rel (%p591_p3) target bundleno = 41 (0x29), region = 16  ;;  %s593_s10 = sshll.u32 (!%p591_p3), %s947_s25, 2 }
  0x1f   : > { %s592_s11 = sshll.u32 (!%p591_p3), %s169_s9, 3  ;;  %s180_s22 = scalar_lea.hbm (!%p591_p3), %s1109_s0, %s593_s10 }
  0x20   : > { %s181_s24 = sshll.u32 (!%p591_p3), %s180_s22, 4  ;;  %s173_s27 = scalar_lea.vmem (!%p591_p3), [#allocation2], %s592_s11  ;;  %s182_s24 = int_to_ptr.hbm [resolvable:$true] %s181_s24 }
  0x21   : > { %s183_s29 = sshll.u32 (!%p591_p3), %s173_s27, 4  ;;  %s170_s30 = scalar_lea.sflag (!%p591_p3), [#allocation3], %s169_s9  ;;  %s184_s29 = int_to_ptr.vmem [resolvable:$true] %s183_s29 }
  0x22   : > { %s874_s4 = smov (!%p591_p3), 128   ;;  %s875_s23 = smov (!%p591_p3), 64  }
  0x23   : > { %s876_s19 = smov 4   ;;  %192 = sbr.rel (!%p956_p6) target bundleno = 41 (0x29), region = 24 }
  0x24   : > { %608 = dma.hbm_to_vmem [thread:$0]  (%p956_p6), %s182_s24, 128, %s184_s29, %s170_s30, %s874_s4, %s875_s23, %s876_s19  }
  0x25   : > { %s594_s6 = sshll.u32 (%p956_p6), %s169_s9, 1  ;;  %s200_s10 = scalar_lea.vmem (%p956_p6), %s1110_s1, %s947_s25 }
  0x26   : > { %v217_v0 = vld [vmem:[%s200_s10] sm:$0x1] (%p956_p6)  ;;  %v219_v1 = vld [vmem:[%s200_s10 + $0x2] sm:$0x1] (%p956_p6)  ;;  %s196_s11 = scalar_lea.vmem (%p956_p6), [#allocation5], %s594_s6 }
  0x27   : > { %218 = vst [vmem:[%s196_s11] sm:$0x1] (%p956_p6), %v217_v0 }
  0x28   : > { %220 = vst [vmem:[%s196_s11 + $0x1] sm:$0x1] %v219_v1 }
  0x29 PF: > { %p595_p4 = scmp.ge.s32.totalorder %s872_s20, 1  ;;  %p239_p5 = scmp.lt.s32.totalorder %s872_s20, 3 }
  0x2b   : > { %p240_p7 = pnand %p595_p4, %p239_p5 }
  0x2c   : > { %s1006_s19 = sand.u32 (!%p240_p7), 1, %s856_s16  }
  0x2d   : > { %243 = sbr.rel (%p240_p7) target bundleno = 255 (0xff), region = 58  ;;  %s596_s17 = sshll.u32 (!%p240_p7), %s1006_s19, 3 }
  0x2e   : > { %s246_s23 = scalar_lea.sflag (!%p240_p7), [#allocation3], %s1006_s19  ;;  %s249_s25 = scalar_lea.vmem (!%p240_p7), [#allocation2], %s596_s17 }
  0x32   : > { %827 = dma.done.wait (%p961_p8), %s246_s23, 128  }
  0x33   : > { %829 = vsyncadd (%p961_p8), %s246_s23, 4294967168  ;;  %vm308_vm0 = vcmask 1043456   ;;  %v302_v2 = vld [vmem:[%s249_s25] sm:$0xf]  ;;  %v303_v3 = vld [vmem:[%s249_s25 + $0x4] sm:$0xf]  ;;  %v375_v40 = vlaneseq }
  0x34   : > { %v309_v4 = vsel %vm308_vm0, %v302_v2, -inf  ;;  %v316_v5 = vsel %vm308_vm0, %v303_v3, -inf  ;;  %s597_s26 = sshll.u32 %s1006_s19, 1  ;;  %v877_v0 = vmov 0.0   ;;  %s1025_s5 = sand.u32 1, %s844_s13   ;;  %vm299_vm11 = vcmask 25600  }
  0x35   : > { %v310_v6 = vrot.slane %v309_v4, 4  ;;  %v317_v7 = vrot.slane %v316_v5, 4  ;;  %s258_s28 = scalar_lea.vmem [#allocation5], %s597_s26  ;;  %v376_v45 = vshrl.u32 %v375_v40, 7  ;;  %s598_s6 = sshll.u32 %s1025_s5, 1  ;;  %vm410_vm12 = vcmask 1041409  }
  0x36   : > { %v304_v38 = vld [vmem:[%s258_s28] sm:$0x1]  ;;  %v305_v41 = vld [vmem:[%s258_s28 + $0x1] sm:$0x1]  ;;  %s281_s9 = scalar_lea.vmem [#allocation6], %s598_s6  ;;  %s1029_s15 = scalar_lea.vmem [#allocation7], %s598_s6 }
  0x37   : > { %v311_v8 = vmax.f32 %v309_v4, %v310_v6  ;;  %v318_v9 = vmax.f32 %v316_v5, %v317_v7  ;;  %v306_v39 = vunpack.c.0.s8 %v304_v38  ;;  %v307_v48 = vunpack.c.0.s8 %v305_v41  ;;  %300 = vst.msk [vmem:[%s281_s9] sm:$0x3] %vm299_vm11, %v877_v0  ;;  %s604_s21 = sshll.u32 %s864_s18, 1  ;;  %s443_s10 = sshll.u32 %s281_s9, 4  ;;  %s444_s10 = int_to_ptr.vmem [resolvable:$true] %s443_s10 }
  0x38   : > { %301 = vst.msk [vmem:[%s1029_s15] sm:$0x3] %vm299_vm11, %v877_v0  ;;  %s441_s27 = scalar_lea.hbm %s1111_s2, %s604_s21  ;;  %s455_s4 = scalar_lea.hbm %s1112_s3, %s604_s21 }
  0x39   : > { %v312_v10 = vrot.slane %v311_v8, 2  ;;  %v319_v11 = vrot.slane %v318_v9, 2  ;;  %v377_v46 = vperm.slane %v306_v39, 0  ;;  %v378_v60 = vperm.slane %v307_v48, 0  ;;  %s445_s11 = sshll.u32 %s441_s27, 4  ;;  %s457_s18 = sshll.u32 %s1029_s15, 4  ;;  %s446_s11 = int_to_ptr.hbm [resolvable:$true] %s445_s11  ;;  %s1046_s18 = int_to_ptr.vmem [resolvable:$true] %s457_s18 }
  0x3a   : > { %s459_s19 = sshll.u32 %s455_s4, 4  ;;  %s426_s17 = scalar_lea.sflag [#allocation4], %s1025_s5  ;;  %s1048_s19 = int_to_ptr.hbm [resolvable:$true] %s459_s19 }
  0x3b   : > { %v313_v12 = vmax.f32 %v311_v8, %v312_v10  ;;  %v320_v13 = vmax.f32 %v318_v9, %v319_v11  ;;  %vm379_vm6 = vcmp.eq.s32.totalorder %v377_v46, %v376_v45  ;;  %vm380_vm10 = vcmp.eq.s32.totalorder %v378_v60, %v376_v45  ;;  %s748_s23 = sshra.s32 %s446_s11, 4  ;;  %s754_s6 = scalar_lea.hbm %s1111_s2, 4  ;;  %s749_s23 = int_to_ptr.hbm [resolvable:$true] %s748_s23 }
  0x3c   : > { %v600_v1 = vsel %vm379_vm6, 1.0, %v877_v0  ;;  %v601_v8 = vsel %vm380_vm10, 1.0, %v877_v0  ;;  %s750_s25 = scalar_lea.hbm %s749_s23, 2  ;;  %p755_p10 = scmp.lt.s32.totalorder %s749_s23, %s1111_s2 }
  0x3d   : > { %v314_v14 = vrot.slane %v313_v12, 1  ;;  %v321_v15 = vrot.slane %v320_v13, 1  ;;  %p751_p6 = scmp.ne.s32.totalorder %s749_s23, %s750_s25  ;;  %p756_p11 = scmp.lt.s32.totalorder %s754_s6, %s750_s25 }
  0x3f   : > { %v315_v16 = vmax.f32 %v313_v12, %v314_v14  ;;  %v322_v17 = vmax.f32 %v320_v13, %v321_v15  ;;  %p752_p8 = pnand %p751_p6, %p979_p1  ;;  %p757_p12 = por %p756_p11, %p755_p10 }
  0x41   : > { %v323_v18 = vsub.f32 %v302_v2, %v315_v16  ;;  %v324_v19 = vsub.f32 %v303_v3, %v322_v17  ;;  %p753_p9 = pneg %p752_p8 }
  0x43   : > { %v325_v20 = vmul.f32 1.442695, %v323_v18  ;;  %v327_v21 = vmul.f32 1.442695, %v324_v19  ;;  %v407_v19 = vand.u32 127, %v375_v40  ;;  %p758_p13 = pnand %p757_p12, %p753_p9 }
  0x45   : > { %698 = vpow2.f32 %v325_v20 }
  0x46   : > { %700 = vpow2.f32 %v327_v21 }
  0x4b   : > { %v699_v22 = vpop.eup %698 }
  0x4c   : > { %v701_v23 = vpop.eup %700  ;;  %v329_v24 = vsel %vm308_vm0, %v699_v22, 0.0 }
  0x4d   : > { %v330_v25 = vrot.slane %v329_v24, 4  ;;  %v336_v26 = vsel %vm308_vm0, %v701_v23, 0.0 }
  0x4e   : > { %v337_v27 = vrot.slane %v336_v26, 4 }
  0x4f   : > { %v331_v28 = vadd.f32 %v330_v25, %v329_v24 }
  0x50   : > { %v338_v29 = vadd.f32 %v337_v27, %v336_v26  ;;  %v416_v27 = vld [vmem:[%s1029_s15] sm:$0x3] }
  0x51   : > { %v332_v30 = vrot.slane %v331_v28, 2 }
  0x52   : > { %v339_v31 = vrot.slane %v338_v29, 2 }
  0x53   : > { %v333_v32 = vadd.f32 %v332_v30, %v331_v28 }
  0x54   : > { %v340_v33 = vadd.f32 %v339_v31, %v338_v29 }
  0x55   : > { %v334_v34 = vrot.slane %v333_v32, 1 }
  0x56   : > { %v341_v35 = vrot.slane %v340_v33, 1 }
  0x57   : > { %v335_v36 = vadd.f32 %v334_v34, %v333_v32 }
  0x58   : > { %v342_v37 = vadd.f32 %v341_v35, %v340_v33 }
  0x59   : > { %702 = vrcp.f32 %v335_v36  ;;  %vm348_vm1 = vweird.f32 %v335_v36  ;;  %v354_v47 = vand.u32 2147483648, %v335_v36  ;;  %v352_v51 = vand.u32 2147483647, %v335_v36 }
  0x5a   : > { %704 = vrcp.f32 %v342_v37  ;;  %v369_v52 = vand.u32 2147483648, %v342_v37  ;;  %vm363_vm3 = vweird.f32 %v342_v37  ;;  %v367_v54 = vand.u32 2147483647, %v342_v37 }
  0x5b   : > { %v355_v56 = vor.u32 1.1754944e-38, %v354_v47  ;;  %vm353_vm7 = vcmp.eq.f32.partialorder %v352_v51, 8.507059e+37 }
  0x5c   : > { %v370_v59 = vor.u32 1.1754944e-38, %v369_v52  ;;  %vm368_vm9 = vcmp.eq.f32.partialorder %v367_v54, 8.507059e+37 }
  0x5f   : > { %v703_v42 = vpop.eup %702 }
  0x60   : > { %v705_v43 = vpop.eup %704  ;;  %v344_v44 = vmul.f32 %v703_v42, %v335_v36  ;;  %vm349_vm2 = vweird.f32 %v703_v42 }
  0x61   : > { %v359_v49 = vmul.f32 %v705_v43, %v342_v37  ;;  %vm364_vm4 = vweird.f32 %v705_v43  ;;  %vm350_vm5 = vmor %vm348_vm1, %vm349_vm2 }
  0x62   : > { %v345_v50 = vsub.f32 1.0, %v344_v44  ;;  %vm365_vm8 = vmor %vm363_vm3, %vm364_vm4 }
  0x63   : > { %v360_v53 = vsub.f32 1.0, %v359_v49 }
  0x64   : > { %v346_v55 = vmul.f32 %v703_v42, %v345_v50 }
  0x65   : > { %v361_v57 = vmul.f32 %v705_v43, %v360_v53 }
  0x66   : > { %v347_v58 = vadd.f32 %v703_v42, %v346_v55 }
  0x67   : > { %v362_v61 = vadd.f32 %v705_v43, %v361_v57 }
  0x68   : > { %v351_v62 = vsel %vm350_vm5, %v703_v42, %v347_v58 }
  0x69   : > { %v356_v63 = vsel %vm353_vm7, %v355_v56, %v351_v62  ;;  %v366_v2 = vsel %vm365_vm8, %v705_v43, %v362_v61 }
  0x6a   : > { %v373_v3 = vmul.f32 %v699_v22, %v356_v63  ;;  %v371_v4 = vsel %vm368_vm9, %v370_v59, %v366_v2  ;;  %v403_v22 = vld [vmem:[%s281_s9] sm:$0x3] }
  0x6b   : > { %v374_v5 = vmul.f32 %v701_v23, %v371_v4 }
  0x6c   : > { %v385_v6 = vmul.f32 %v600_v1, %v373_v3  ;;  %v393_v7 = vmul.f32 %v373_v3, %v373_v3 }
  0x6d   : > { %v394_v11 = vmul.f32 %v374_v5, %v374_v5  ;;  %v386_v13 = vmul.f32 %v601_v8, %v374_v5 }
  0x6e   : > { %v387_v9 = vsel %vm308_vm0, %v385_v6, 0.0  ;;  %v395_v10 = vadd.f32 %v600_v1, %v393_v7 }
  0x6f   : > { %388 = vadd.xlane.f32.xlu0 %v387_v9  ;;  %v396_v14 = vadd.f32 %v601_v8, %v394_v11  ;;  %v390_v15 = vsel %vm308_vm0, %v386_v13, 0.0 }
  0x70   : > { %v397_v12 = vsel %vm308_vm0, %v395_v10, 0.0 }
  0x71   : > { %398 = vadd.xlane.f32.xlu1 %v397_v12  ;;  %v400_v16 = vsel %vm308_vm0, %v396_v14, 0.0 }
  0x77   : > { %391 = vadd.xlane.f32.xlu0 %v390_v15 }
  0x79   : > { %401 = vadd.xlane.f32.xlu1 %v400_v16 }
  0xe2   : > { %v389_v17 = vpop.xlane.xlu0 %388 }
  0xe3   : > { %v408_v21 = vperm.slane %v389_v17, %v407_v19 }
  0xe4   : > { %v399_v18 = vpop.xlane.xlu1 %398 }
  0xe5   : > { %v419_v25 = vperm.slane %v399_v18, %v407_v19 }
  0xea   : > { %v392_v20 = vpop.xlane.xlu0 %391 }
  0xeb   : > { %v409_v23 = vperm.slane %v392_v20, %v407_v19 }
  0xec   : > { %v402_v24 = vpop.xlane.xlu1 %401 }
  0xed   : > { %v411_v26 = vsel %vm410_vm12, %v409_v23, %v408_v21  ;;  %v420_v28 = vperm.slane %v402_v24, %v407_v19 }
  0xee   : > { %v413_v29 = vadd.f32 %v411_v26, %v403_v22 }
  0xef   : > { %v421_v30 = vsel %vm410_vm12, %v420_v28, %v419_v25 }
  0xf0   : > { %415 = vst.msk [vmem:[%s281_s9] sm:$0x3] %vm299_vm11, %v413_v29  ;;  %v423_v31 = vadd.f32 %v421_v30, %v416_v27 }
  0xf1   : > { %761 = shalt.err (!%p758_p13)
}
  0xf2   : > { %610 = dma.vmem_to_hbm [thread:$0]  (%p979_p1), %s444_s10, 32, %s446_s11, %s426_s17   ;;  %424 = vst.msk [vmem:[%s1029_s15] sm:$0x3] %vm299_vm11, %v423_v31 }
  0xf3   : > { %s431_s9 = scalar_lea.sflag [#allocation8], %s1025_s5  ;;  %s776_s24 = sshra.s32 %s1048_s19, 4  ;;  %s777_s24 = int_to_ptr.hbm [resolvable:$true] %s776_s24 }
  0xf4   : > { %s778_s27 = scalar_lea.hbm %s777_s24, 2  ;;  %s782_s4 = scalar_lea.hbm %s1112_s3, 4 }
  0xf5   : > { %p779_p0 = scmp.ne.s32.totalorder %s777_s24, %s778_s27  ;;  %p783_p7 = scmp.lt.s32.totalorder %s777_s24, %s1112_s3 }
  0xf6   : > { %p784_p6 = scmp.lt.s32.totalorder %s782_s4, %s778_s27 }
  0xf7   : > { %p780_p4 = pnand %p779_p0, %p979_p1 }
  0xf8   : > { %p785_p8 = por %p784_p6, %p783_p7 }
  0xf9   : > { %p781_p5 = pneg %p780_p4 }
  0xfb   : > { %p786_p9 = pnand %p785_p8, %p781_p5 }
  0xfd   : > { %789 = shalt.err (!%p786_p9)
}
  0xfe   : > { %611 = dma.vmem_to_hbm [thread:$0]  (%p979_p1), %s1046_s18, 32, %s1048_s19, %s431_s9  }
  0xff PF: > { %s471_s5 = sand.u32 1, %s840_s12   ;;  %p615_p10 = pnand %p591_p3, %p983_p2 }
 0x100   : > { %s472_s15 = scalar_lea.sflag [#allocation4], %s471_s5 }
 0x101   : > { %p616_p11 = pneg %p615_p10 }
 0x103   : > { %831 = dma.done.wait (%p616_p11), %s472_s15, 32  }
 0x104   : > { %833 = vsyncadd (%p616_p11), %s472_s15, 4294967264  ;;  %s482_s10 = scalar_lea.sflag [#allocation8], %s471_s5 }
 0x105   : > { %835 = dma.done.wait (%p616_p11), %s482_s10, 32  }
 0x106   : > { %837 = vsyncadd (%p616_p11), %s482_s10, 4294967264  ;;  %s23_s20 = sadd.s32 1, %s872_s20   ;;  %s1125_s7 = sld [smem:[#allocation15_spill]] }
 0x107   : > { %p20_p12 = scmp.ge.s32.totalorder %s23_s20, 4   ;;  %s1126_s11 = sld [smem:[#allocation12_spill]] }
 0x108   : > { %s1127_s17 = sld [smem:[#allocation16_spill]]  ;;  %s1130_s12 = smov %s844_s13 }
 0x109   : > { %s1128_s18 = sld [smem:[#allocation13_spill]]  ;;  %s1131_s13 = smov %s848_s14 }
 0x10a   : > { %s1129_s19 = sld [smem:[#allocation14_spill]]  ;;  %s1133_s15 = smov %s856_s16 }
 0x10b   :  { %22 = sbr.rel (!%p20_p12) target bundleno = 10 (0xa), region = 136 }
 0x10c   : > { %s1132_s14 = smov %s1125_s7 }
 0x10d   : > { %s1134_s16 = smov %s1126_s11 }
 0x110   :  { %488 = vsyncpa [#allocation3], 1 }
 0x111   :  { %490 = vsyncpa [#allocation3 + $0x1], 1 }
 0x112   :  { %491 = vsyncpa [#allocation4], 1 }
 0x113   :  { %493 = vsyncpa [#allocation4 + $0x1], 1 }
 0x114   :  { %494 = vsyncpa [#allocation8], 1 }
 0x115   :  { %496 = vsyncpa [#allocation8 + $0x1], 1 }

</bundles_post_ra>
